<compile_context>
chip_gen: v7x
topology: tpu7x:2x2x1
jax: 0.10.0
libtpu: 0.0.40
codegen_flags: <defaults>
</compile_context>

<pallas_src>
import jax
import jax.numpy as jnp
from jax.experimental import pallas as pl
from jax.experimental.pallas import tpu as pltpu


def _round_up(x, m):
    return ((x + m - 1) // m) * m


def _fused_matvec_sigmoid_kernel(x_ref, w_ref, b_ref, o_ref, acc_ref):
    """out_tile = sigmoid(x_tile @ w_eff + b_eff), accumulated over the P grid axis.

    x_ref  : (TB, TP) bf16  batch tile of flattened weight-space features
    w_ref  : (1, TP)  bf16  slice of the collapsed weight row
    b_ref  : (1,)     f32   collapsed scalar bias (SMEM)
    o_ref  : (TB, 1)  f32   output tile, resident across the P grid axis
    acc_ref: (TB, 1)  f32   VMEM accumulator
    """
    k = pl.program_id(1)

    @pl.when(k == 0)
    def _init():
        acc_ref[...] = jnp.zeros_like(acc_ref)

    # VPU multiply + cross-lane reduce (a (TB,TP)@(TP,1) MXU matvec would waste
    # 255/256 of the MXU columns); accumulate in f32.
    prod = x_ref[...].astype(jnp.float32) * w_ref[...].astype(jnp.float32)
    acc_ref[...] += jnp.sum(prod, axis=-1, keepdims=True)

    @pl.when(k == pl.num_programs(1) - 1)
    def _finalize():
        o_ref[...] = jax.nn.sigmoid(acc_ref[...] + b_ref[0]).astype(o_ref.dtype)


def invariant_nfn_forward(embedding_weights, embedding_biases, params,
                          *, block_b=512, block_p=2048):
    """embedding_weights: list of (B, d_out, d_in); embedding_biases: list of (B, d_out)."""
    B = embedding_weights[0].shape[0]

    # Single-pass flatten/concat (torch.flatten(start_dim=1) + cat(dim=1): all
    # weights first, then all biases), done directly in the bf16 compute dtype
    # so the concat only writes half the bytes.
    parts = ([w.reshape(B, -1).astype(jnp.bfloat16) for w in embedding_weights]
             + [b.reshape(B, -1).astype(jnp.bfloat16) for b in embedding_biases])
    x = jnp.concatenate(parts, axis=1)                       # (B, P) bf16
    P = x.shape[1]

    w1, b1, w2, b2 = params                                  # (P,H), (1,H), (H,1), (1,1)
    # Exact algebraic collapse: no nonlinearity sits between the embedding
    # Linear(P, H) and the final Linear(H, 1), so fold them once in the wrapper.
    w_eff = (w1.astype(jnp.float32) @ w2.astype(jnp.float32)).reshape(1, P)    # (1, P)
    b_eff = (b1.astype(jnp.float32) @ w2.astype(jnp.float32) + b2).reshape(1)  # (1,) f32
    w_eff = w_eff.astype(jnp.bfloat16)

    # Tile sizes: sublane-aligned batch tile (bf16 native tile is (16, 128)),
    # lane-aligned P tile.  Zero-padding does not change the dot product.
    tb = min(block_b, _round_up(B, 16))
    tp = min(block_p, _round_up(P, 128))
    b_pad = _round_up(B, tb)
    p_pad = _round_up(P, tp)
    x = jnp.pad(x, ((0, b_pad - B), (0, p_pad - P)))
    w_eff = jnp.pad(w_eff, ((0, 0), (0, p_pad - P)))

    nb = b_pad // tb
    nk = p_pad // tp

    out = pl.pallas_call(
        _fused_matvec_sigmoid_kernel,
        out_shape=jax.ShapeDtypeStruct((b_pad, 1), jnp.float32),
        grid=(nb, nk),
        in_specs=[
            pl.BlockSpec((tb, tp), lambda i, k: (i, k)),         # x tile
            pl.BlockSpec((1, tp), lambda i, k: (0, k)),          # w_eff slice
            pl.BlockSpec(memory_space=pltpu.MemorySpace.SMEM),   # scalar bias
        ],
        out_specs=pl.BlockSpec((tb, 1), lambda i, k: (i, 0)),
        scratch_shapes=[pltpu.VMEM((tb, 1), jnp.float32)],
        compiler_params=pltpu.CompilerParams(
            # Batch axis is independent -> shard across TensorCores (v7x);
            # P is the reduction axis -> last and "arbitrary".
            dimension_semantics=("parallel", "arbitrary"),
            vmem_limit_bytes=48 * 1024 * 1024,
        ),
        cost_estimate=pl.CostEstimate(
            flops=2 * b_pad * p_pad,
            transcendentals=b_pad,
            bytes_accessed=b_pad * p_pad * 2 + nb * p_pad * 2 + b_pad * 4 + 4,
        ),
    )(x, w_eff, b_eff)

    return out[:B]


def _reference_forward(embedding_weights, embedding_biases, params):
    """Unfused f32 reference matching the PyTorch module exactly."""
    B = embedding_weights[0].shape[0]
    w_flat = jnp.concatenate([w.reshape(B, -1) for w in embedding_weights], axis=1)
    b_flat = jnp.concatenate([b.reshape(B, -1) for b in embedding_biases], axis=1)
    x = jnp.concatenate([w_flat, b_flat], axis=1).astype(jnp.float32)
    w1, b1, w2, b2 = params
    h = x @ w1 + b1
    z = h @ w2 + b2
    return jax.nn.sigmoid(z)


def init_params(key, num_params, num_out_embedding=10):
    """Deterministic xavier-normal style init for the two Linear layers."""
    k1, k2, k3, k4 = jax.random.split(key, 4)
    H = num_out_embedding
    std1 = (2.0 / (num_params + H)) ** 0.5
    std2 = (2.0 / (H + 1)) ** 0.5
    w1 = std1 * jax.random.normal(k1, (num_params, H), jnp.float32)   # Linear(P, H), transposed
    b1 = 0.01 * jax.random.normal(k2, (1, H), jnp.float32)
    w2 = std2 * jax.random.normal(k3, (H, 1), jnp.float32)            # Linear(H, 1), transposed
    b2 = 0.01 * jax.random.normal(k4, (1, 1), jnp.float32)
    return (w1, b1, w2, b2)


if __name__ == "__main__":
    key = jax.random.PRNGKey(0)
    kw0, kw1, kb0, kb1, kp = jax.random.split(key, 5)

    # Weight-space samples of a small 16 -> 32 -> 8 MLP, batch of 32 networks.
    B = 32
    embedding_weights = [
        jax.random.normal(kw0, (B, 32, 16), jnp.float32),
        jax.random.normal(kw1, (B, 8, 32), jnp.float32),
    ]
    embedding_biases = [
        jax.random.normal(kb0, (B, 32), jnp.float32),
        jax.random.normal(kb1, (B, 8), jnp.float32),
    ]
    num_params = 32 * 16 + 8 * 32 + 32 + 8   # 808
    num_out_embedding = 10

    params = init_params(kp, num_params, num_out_embedding)

    # Small blocks so the test exercises both the parallel batch axis (2 blocks)
    # and the P reduction axis (4 blocks) of the tiled kernel.
    out = invariant_nfn_forward(embedding_weights, embedding_biases, params,
                                block_b=16, block_p=256)
    out = jax.block_until_ready(out)

    ref = _reference_forward(embedding_weights, embedding_biases, params)
    assert out.shape == (B, 1), out.shape
    # bf16 inputs -> loosened tolerance vs. the unfused f32 reference; this also
    # guards the exactness of the w1@w2 algebraic collapse.
    assert jnp.allclose(out, ref, atol=1e-2), (out, ref)

    print("KERNEL_OK")
</pallas_src>

<mosaic_0001>
module attributes {stable_mosaic.version = 11 : i64} {
  func.func @_fused_matvec_sigmoid_kernel(%arg0: i32, %arg1: i32, %arg2: memref<16x256xbf16, #tpu.memory_space<vmem>>, %arg3: memref<1x256xbf16, #tpu.memory_space<vmem>>, %arg4: memref<1xf32, #tpu.memory_space<smem>>, %arg5: memref<16x1xf32, #tpu.memory_space<vmem>>, %arg6: memref<16x1xf32, #tpu.memory_space<vmem>>) attributes {dimension_semantics = [#tpu.dimension_semantics<parallel>, #tpu.dimension_semantics<arbitrary>], iteration_bounds = array<i64: 2, 4>, scalar_prefetch = 0 : i64, scratch_operands = 1 : i64, tpu.core_type = #tpu.core_type<tc>, window_params = [{transform_indices = @transform_0, window_bounds = array<i64: 16, 256>}, {transform_indices = @transform_1, window_bounds = array<i64: 1, 256>}, {transform_indices = @transform_2, window_bounds = array<i64: 1>}, {transform_indices = @transform_3, window_bounds = array<i64: 16, 1>}]} {
    %c0_i32 = arith.constant 0 : i32
    %0 = arith.cmpi eq, %arg1, %c0_i32 : i32
    %1 = arith.extui %0 : i1 to i32
    %c0_i32_0 = arith.constant 0 : i32
    %2 = arith.cmpi ne, %1, %c0_i32_0 : i32
    scf.if %2 {
      %cst_9 = arith.constant 0.000000e+00 : f32
      %17 = vector.broadcast %cst_9 : f32 to vector<16x1xf32>
      %c0_10 = arith.constant 0 : index
      %c0_11 = arith.constant 0 : index
      %18 = vector.load %arg6[%c0_10, %c0_11] : memref<16x1xf32, #tpu.memory_space<vmem>>, vector<16x1xf32>
      tpu.vector_store %arg6[%c0_10, %c0_11], %17 {strides = array<i32>} : memref<16x1xf32, #tpu.memory_space<vmem>>, vector<16x1xf32>,
    } else {
    }
    %c0 = arith.constant 0 : index
    %c0_1 = arith.constant 0 : index
    %3 = vector.load %arg2[%c0, %c0_1] : memref<16x256xbf16, #tpu.memory_space<vmem>>, vector<16x256xbf16>
    %4 = arith.extf %3 : vector<16x256xbf16> to vector<16x256xf32>
    %c0_2 = arith.constant 0 : index
    %c0_3 = arith.constant 0 : index
    %5 = vector.load %arg3[%c0_2, %c0_3] : memref<1x256xbf16, #tpu.memory_space<vmem>>, vector<1x256xbf16>
    %6 = arith.extf %5 : vector<1x256xbf16> to vector<1x256xf32>
    %7 = vector.broadcast %6 : vector<1x256xf32> to vector<16x256xf32>
    %8 = arith.mulf %4, %7 : vector<16x256xf32>
    %c0_4 = arith.constant 0 : index
    %c0_5 = arith.constant 0 : index
    %9 = vector.load %arg6[%c0_4, %c0_5] : memref<16x1xf32, #tpu.memory_space<vmem>>, vector<16x1xf32>
    %cst = arith.constant dense<0.000000e+00> : vector<16xf32>
    %10 = vector.multi_reduction <add>, %8, %cst [1] : vector<16x256xf32> to vector<16xf32>
    %11 = vector.shape_cast %10 : vector<16xf32> to vector<16x1xf32>
    %12 = arith.addf %9, %11 : vector<16x1xf32>
    %c0_6 = arith.constant 0 : index
    %c0_7 = arith.constant 0 : index
    %13 = vector.load %arg6[%c0_6, %c0_7] : memref<16x1xf32, #tpu.memory_space<vmem>>, vector<16x1xf32>
    tpu.vector_store %arg6[%c0_6, %c0_7], %12 {strides = array<i32>} : memref<16x1xf32, #tpu.memory_space<vmem>>, vector<16x1xf32>,
    %c3_i32 = arith.constant 3 : i32
    %14 = arith.cmpi eq, %arg1, %c3_i32 : i32
    %15 = arith.extui %14 : i1 to i32
    %c0_i32_8 = arith.constant 0 : i32
    %16 = arith.cmpi ne, %15, %c0_i32_8 : i32
    scf.if %16 {
      %c0_9 = arith.constant 0 : index
      %c0_10 = arith.constant 0 : index
      %17 = vector.load %arg6[%c0_9, %c0_10] : memref<16x1xf32, #tpu.memory_space<vmem>>, vector<16x1xf32>
      %c0_11 = arith.constant 0 : index
      %18 = memref.load %arg4[%c0_11] : memref<1xf32, #tpu.memory_space<smem>>
      %19 = vector.broadcast %18 : f32 to vector<16x1xf32>
      %20 = arith.addf %17, %19 : vector<16x1xf32>
      %21 = arith.negf %20 : vector<16x1xf32>
      %22 = math.exp %21 : vector<16x1xf32>
      %cst_12 = arith.constant 1.000000e+00 : f32
      %23 = vector.broadcast %cst_12 : f32 to vector<16x1xf32>
      %24 = arith.addf %23, %22 : vector<16x1xf32>
      %25 = arith.divf %23, %24 : vector<16x1xf32>
      %c0_13 = arith.constant 0 : index
      %c0_14 = arith.constant 0 : index
      %26 = vector.load %arg5[%c0_13, %c0_14] : memref<16x1xf32, #tpu.memory_space<vmem>>, vector<16x1xf32>
      tpu.vector_store %arg5[%c0_13, %c0_14], %25 {strides = array<i32>} : memref<16x1xf32, #tpu.memory_space<vmem>>, vector<16x1xf32>,
    } else {
    }
    return
  }
  func.func @transform_0(%arg0: i32, %arg1: i32) -> (i32, i32) {
    %c0_i32 = arith.constant 0 : i32
    return %arg0, %arg1 : i32, i32
  }
  func.func @transform_1(%arg0: i32, %arg1: i32) -> (i32, i32) {
    %c0_i32 = arith.constant 0 : i32
    %c0_i32_0 = arith.constant 0 : i32
    return %c0_i32, %arg1 : i32, i32
  }
  func.func @transform_2(%arg0: i32, %arg1: i32) -> i32 {
    %c0_i32 = arith.constant 0 : i32
    %c0_i32_0 = arith.constant 0 : i32
    return %c0_i32 : i32
  }
  func.func @transform_3(%arg0: i32, %arg1: i32) -> (i32, i32) {
    %c0_i32 = arith.constant 0 : i32
    %c0_i32_0 = arith.constant 0 : i32
    return %arg0, %c0_i32 : i32, i32
  }
}

</mosaic_0001>

<bundles_post_ra>
// kernel: tpu_custom_call.1
= control target key start
LH: loop header
LB: loop body
LE: loop exit
PB: predicated region body
PF: predicated region fallthrough
CT: control target
= control target key end

     0   :  { %s1013_s0 = inlined_call_operand.hbm [shape: bf16[32,1024], index: 0, kind: input, shape index: {}]   ;;  %s1014_s1 = inlined_call_operand.hbm [shape: bf16[1,1024], index: 1, kind: input, shape index: {}]   ;;  %s1015_s2 = inlined_call_operand.<no memory space> [shape: f32[1], index: 2, kind: input, shape index: {}]   ;;  %s1016_s3 = inlined_call_operand.vmem [shape: f32[32,1], index: 3, kind: output, shape index: {}]  }
   0x1   :  { %8 = sst [smem:[#allocation3]] %s1015_s2 }
   0x2   :  { %9 = vsyncpa [#allocation5], 0 }
   0x3   :  { %11 = vsyncpa [#allocation5 + $0x1], 0 }
   0x4   :  { %12 = vsyncpa [#allocation7], 0 }
   0x5   :  { %14 = vsyncpa [#allocation7 + $0x1], 0  ;;  %s753_s14 = smov 0   ;;  %s755_s15 = smov 0  }
   0x6   :  { %s757_s16 = smov 0   ;;  %s759_s17 = smov 0  }
   0x7   :  { %s761_s18 = smov 0   ;;  %s763_s19 = smov 0  }
   0x8   :  { %s765_s20 = smov 0   ;;  %s767_s21 = smov 0  }
   0x9   :  { %s769_s2 = smov 0   ;;  %s771_s22 = smov 0  }
   0xa   :  { %s773_s23 = smov 0  }
   0xb LB: > { %s32_s24 = sadd.s32 1, %s718_s22  ;;  %s41_s25 = sadd.s32 1, %s702_s19  ;;  %s722_s23 = sphi %s773_s23, %s20_s23   ;;  %s718_s22 = sphi %s771_s22, %s1041_s22   ;;  %s714_s2 = sphi %s769_s2, %s1040_s2   ;;  %s710_s21 = sphi %s767_s21, %s1039_s21   ;;  %s706_s20 = sphi %s765_s20, %s1038_s20   ;;  %s702_s19 = sphi %s763_s19, %s1037_s19   ;;  %s698_s18 = sphi %s761_s18, %s1036_s18   ;;  %s694_s17 = sphi %s759_s17, %s1035_s17   ;;  %s690_s16 = sphi %s757_s16, %s1034_s16   ;;  %s686_s15 = sphi %s755_s15, %s1033_s15   ;;  %s682_s14 = sphi %s753_s14, %s1032_s14  }
   0xc   : > { %p48_p0 = scmp.ne.s32.totalorder %s702_s19, %s698_s18  ;;  %p1018_p1 = scmp.eq.s32.totalorder %s722_s23, 0 }
   0xd   : > { %p1017_p2 = scmp.lt.s32.totalorder %s722_s23, 8  ;;  %s154_s26 = sand.u32 1, %s702_s19  }
   0xe   : > { %p50_p3 = por %p1018_p1, %p48_p0  ;;  %s435_s27 = sshll.u32 %s154_s26, 4 }
   0xf   : > { %s437_s28 = sshll.u32 %s714_s2, 1  ;;  %s454_s29 = sshll.u32 %s718_s22, 4 }
  0x10   : > { %s158_s30 = scalar_lea.vmem [#allocation4], %s435_s27  ;;  %s165_s5 = sadd.s32 %s454_s29, %s437_s28 }
  0x11   : > { %s168_s4 = sshll.u32 %s158_s30, 4  ;;  %s439_s6 = sshll.u32 %s165_s5, 6  ;;  %s819_s4 = int_to_ptr.vmem [resolvable:$true] %s168_s4 }
  0x12   : > { %p823_p4 = pnand %p1017_p2, %p50_p3  ;;  %s830_s10 = scalar_lea.hbm %s1013_s0, %s439_s6 }
  0x13   : > { %p443_p5 = scmp.ge.s32.totalorder %s722_s23, 1  ;;  %s833_s11 = scalar_lea.sflag [#allocation5], %s154_s26 }
  0x14   : > { %s568_s12 = scalar_lea.hbm %s830_s10, 256  ;;  %p570_p7 = pneg %p823_p4 }
  0x15   : > { %p569_p6 = scmp.ne.s32.totalorder %s830_s10, %s568_s12  ;;  %s573_s28 = scalar_lea.hbm %s1013_s0, 2048 }
  0x16   : > { %p574_p10 = scmp.lt.u32.totalorder %s830_s10, %s1013_s0  ;;  %p575_p11 = scmp.lt.u32.totalorder %s573_s28, %s568_s12 }
  0x17   : > { %p571_p8 = pnand %p570_p7, %p569_p6  ;;  %p577_p13 = scmp.lt.u32.totalorder %s568_s12, %s830_s10 }
  0x18   : > { %p576_p12 = por %p575_p11, %p574_p10 }
  0x19   : > { %p572_p9 = pneg %p571_p8 }
  0x1a   : > { %p578_p0 = por %p577_p13, %p576_p12 }
  0x1c   : > { %p579_p3 = pnand %p578_p0, %p572_p9 }
  0x1e   : > { %582 = shalt.err (!%p579_p3)
}
  0x1f   : > { %s583_s26 = scalar_lea.vmem %s819_s4, 256  ;;  %s724_s5 = smov [#allocation4]  }
  0x20   : > { %p584_p6 = scmp.ne.s32.totalorder %s819_s4, %s583_s26  ;;  %s588_s6 = sshll.u32 %s724_s5, 4  ;;  %s589_s6 = int_to_ptr.vmem [resolvable:$false] %s588_s6 }
  0x21   : > { %s590_s8 = scalar_lea.vmem %s589_s6, 512  ;;  %p591_p1 = scmp.lt.s32.totalorder %s819_s4, %s589_s6 }
  0x22   : > { %p586_p8 = pnand %p584_p6, %p570_p7  ;;  %p592_p10 = scmp.lt.s32.totalorder %s590_s8, %s583_s26 }
  0x24   : > { %p587_p2 = pneg %p586_p8  ;;  %p593_p11 = por %p592_p10, %p591_p1 }
  0x26   : > { %p594_p12 = pnand %p593_p11, %p587_p2 }
  0x28   : > { %597 = shalt.err (!%p594_p12)
}
  0x29   : > { %s725_s9 = smov 512   ;;  %s726_s12 = smov 128  }
  0x2a   : > { %s727_s13 = smov 8   ;;  %p195_p1 = scmp.lt.s32.totalorder %s722_s23, 9 }
  0x2b   : > { %463 = dma.hbm_to_vmem [thread:$0]  (!%p823_p4), %s830_s10, 256, %s819_s4, %s833_s11, %s725_s9, %s726_s12, %s727_s13  }
  0x2c   : > { %p864_p2 = pnand %p443_p5, %p195_p1  ;;  %s431_s28 = sadd.s32 4294967295, %s722_s23  }
  0x2d   : > { %s29_s29 = sadd.s32 1, %s714_s2  ;;  %p54_p9 = scmp.ne.s32.totalorder %s698_s18, %s694_s17 }
  0x2e   : > { %p30_p7 = scmp.ge.s32.totalorder %s29_s29, 4  ;;  %p872_p13 = scmp.eq.s32.totalorder %s431_s28, 0 }
  0x2f   : > { %s67_s4 = sadd.s32 1, %s690_s16  ;;  %p74_p3 = scmp.ne.s32.totalorder %s690_s16, %s686_s15 }
  0x30   : > { %s1043_s29 = smov (%p30_p7, %s29_s29), 0  ;;  %s1045_s24 = smov (!%p30_p7, %s32_s24), %s718_s22 }
  0x31   : > { %s37_s10 = ssub.s32 %s714_s2, %s1043_s29  ;;  %p886_p4 = por %p872_p13, %p54_p9 }
  0x32   : > { %p34_p5 = scmp.ge.s32.totalorder %s1045_s24, 2  ;;  %p65_p0 = scmp.eq.s32.totalorder %s37_s10, 0 }
  0x33   : > { %s1024_s17 = scalar_select %p886_p4, 1, 0 }
  0x34   : > { %p80_p6 = scmp.ne.s32.totalorder %s686_s15, %s682_s14  ;;  %s1047_s24 = smov (%p34_p5, %s1045_s24), 0 }
  0x35   : > { %s897_s11 = scalar_select %p65_p0, %s690_s16, %s67_s4  }
  0x36   : > { %s36_s30 = ssub.s32 %s718_s22, %s1047_s24  ;;  %p1025_p8 = scmp.eq.s32.totalorder %s722_s23, 0 }
  0x37   : > { %s38_s26 = sor.u32 %s37_s10, %s36_s30  ;;  %p905_p11 = por %p80_p6, %p872_p13 }
  0x38   : > { %p76_p10 = por %p74_p3, %p1025_p8  ;;  %p39_p12 = scmp.eq.s32.totalorder %s38_s26, 0 }
  0x39   : > { %s1026_s5 = scalar_select %p905_p11, 1, 0 }
  0x3a   : > { %s178_s6 = sand.u32 1, %s690_s16   ;;  %s455_s9 = sshll.u32 %s714_s2, 5 }
  0x3b   : > { %s440_s8 = sshll.u32 %s178_s6, 1  ;;  %s919_s28 = scalar_lea.hbm %s1014_s1, %s455_s9 }
  0x3c   : > { %s913_s14 = scalar_select %p39_p12, %s702_s19, %s41_s25  }
  0x3d   : > { %s182_s7 = scalar_lea.vmem [#allocation6], %s440_s8  ;;  %p1027_p1 = scmp.lt.s32.totalorder %s722_s23, 8 }
  0x3e   : > { %s190_s4 = sshll.u32 %s182_s7, 4  ;;  %s179_s25 = scalar_lea.sflag [#allocation7], %s178_s6  ;;  %s921_s4 = int_to_ptr.vmem [resolvable:$true] %s190_s4 }
  0x3f   : > { %p925_p7 = pnand %p1027_p1, %p76_p10  ;;  %s598_s30 = scalar_lea.hbm %s919_s28, 32 }
  0x40   : > { %p599_p9 = scmp.ne.s32.totalorder %s919_s28, %s598_s30  ;;  %s603_s9 = scalar_lea.hbm %s1014_s1, 128 }
  0x41   : > { %p600_p13 = pneg %p925_p7  ;;  %p604_p3 = scmp.lt.u32.totalorder %s919_s28, %s1014_s1 }
  0x42   : > { %p605_p6 = scmp.lt.u32.totalorder %s603_s9, %s598_s30  ;;  %p607_p10 = scmp.lt.u32.totalorder %s598_s30, %s919_s28 }
  0x43   : > { %p601_p5 = pnand %p600_p13, %p599_p9 }
  0x44   : > { %p606_p8 = por %p605_p6, %p604_p3 }
  0x45   : > { %p602_p0 = pneg %p601_p5 }
  0x46   : > { %p608_p12 = por %p607_p10, %p606_p8 }
  0x48   : > { %p609_p1 = pnand %p608_p12, %p602_p0 }
  0x4a   : > { %612 = shalt.err (!%p609_p1)
}
  0x4b   : > { %s613_s6 = scalar_lea.vmem %s921_s4, 32  ;;  %s728_s7 = smov [#allocation6]  }
  0x4c   : > { %p614_p9 = scmp.ne.s32.totalorder %s921_s4, %s613_s6  ;;  %s618_s26 = sshll.u32 %s728_s7, 4  ;;  %s619_s26 = int_to_ptr.vmem [resolvable:$false] %s618_s26 }
  0x4d   : > { %s620_s8 = scalar_lea.vmem %s619_s26, 64  ;;  %p621_p4 = scmp.lt.s32.totalorder %s921_s4, %s619_s26 }
  0x4e   : > { %p616_p5 = pnand %p614_p9, %p600_p13  ;;  %p622_p3 = scmp.lt.s32.totalorder %s620_s8, %s613_s6 }
  0x50   : > { %p617_p11 = pneg %p616_p5  ;;  %p623_p6 = por %p622_p3, %p621_p4 }
  0x52   : > { %p624_p8 = pnand %p623_p6, %p617_p11 }
  0x54   : > { %627 = shalt.err (!%p624_p8)
}
  0x55   : > { %466 = dma.hbm_to_vmem [thread:$0]  (!%p925_p7), %s919_s28, 32, %s921_s4, %s179_s25  }
  0x56   : > { %199 = sbr.rel (%p864_p2) target bundleno = 306 (0x132), region = 32  ;;  %s201_s30 = sand.u32 (!%p864_p2), 1, %s698_s18  }
  0x57   : > { %s444_s9 = sshll.u32 (!%p864_p2), %s201_s30, 4  ;;  %s202_s12 = scalar_lea.sflag (!%p864_p2), [#allocation5], %s201_s30 }
  0x58   : > { %s205_s13 = scalar_lea.vmem (!%p864_p2), [#allocation4], %s444_s9  ;;  %p1029_p13 = scmp.ne.s32.totalorder (!%p864_p2), %s1024_s17, 0 }
  0x5d   : > { %673 = dma.done.wait (%p1029_p13), %s202_s12, 256  }
  0x5e   : > { %675 = vsyncadd (%p1029_p13), %s202_s12, 4294967040  ;;  %s210_s10 = sand.u32 1, %s686_s15   ;;  %p1030_p4 = scmp.ne.s32.totalorder %s1026_s5, 0 }
  0x5f   : > { %s445_s6 = sshll.u32 %s210_s10, 1  ;;  %s211_s7 = scalar_lea.sflag [#allocation7], %s210_s10 }
  0x60   : > { %s214_s28 = scalar_lea.vmem [#allocation6], %s445_s6 }
  0x61   : > { %677 = dma.done.wait (%p1030_p4), %s211_s7, 32  }
  0x62   : > { %679 = vsyncadd (%p1030_p4), %s211_s7, 4294967264  ;;  %s446_s27 = sshll.u32 %s710_s21, 1  ;;  %p448_p11 = scmp.ne.s32.totalorder %s706_s20, 0 }
  0x63   : > { %p246_p2 = scmp.lt.s32.totalorder %s446_s27, 3  ;;  %vm255_vm0 = vcmask (!%p448_p11), 7168   ;;  %v729_v0 = vmov (!%p448_p11), 0.0  }
  0x64   : > { %254 = sbr.rel (%p448_p11) target bundleno = 107 (0x6b), region = 44  ;;  %256 = vst.msk [vmem:[#allocation2] sm:$0xff] (!%p448_p11), %vm255_vm0, %v729_v0  ;;  %257 = vst.msk [vmem:[#allocation2 + $0x8] sm:$0xff] (!%p448_p11), %vm255_vm0, %v729_v0 }
  0x65   : > { %s1049_s27 = smov (!%p246_p2, %s446_s27), 3 }
  0x66   : > { %s447_s4 = sshll.u32 %s1049_s27, 3 }
  0x67   : > { %s970_s17 = scalar_lea.vmem %s1016_s3, %s447_s4 }
  0x6b PF: > { %v264_v1 = vld [vmem:[%s214_s28] sm:$0x3]  ;;  %v267_v2 = vlaneseq  ;;  %v259_v6 = vld [vmem:[%s205_s13 + $0x8] sm:$0xff]  ;;  %v289_v23 = vld [vmem:[#allocation2] sm:$0xff]  ;;  %vm299_vm1 = vcmask 7168   ;;  %p449_p7 = scmp.ne.s32.totalorder %s706_s20, 3 }
  0x6c   : > { %v258_v3 = vld [vmem:[%s205_s13] sm:$0xff]  ;;  %v265_v4 = vunpack.c.l.bf16 %v264_v1  ;;  %v262_v13 = vunpack.c.l.bf16 %v259_v6  ;;  %v263_v14 = vunpack.c.h.bf16 %v259_v6  ;;  %v290_v26 = vld [vmem:[#allocation2 + $0x8] sm:$0xff]  ;;  %s308_s21 = sld [smem:[#allocation3]] (!%p449_p7) }
  0x6d   : > { %v268_v5 = vshrl.u32 %v267_v2, 7  ;;  %v260_v9 = vunpack.c.l.bf16 %v258_v3  ;;  %v261_v10 = vunpack.c.h.bf16 %v258_v3 }
  0x6f   : > { %v269_v7 = vsub.s32 0, %v268_v5  ;;  %v273_v8 = vsub.s32 2, %v268_v5 }
  0x71   : > { %v270_v11 = vrot.slane %v265_v4, %v269_v7  ;;  %v274_v12 = vrot.slane %v265_v4, %v273_v8 }
  0x72   : > { %v309_v31 = vstv (!%p449_p7), %s308_s21 }
  0x73   : > { %v280_v15 = vrot.slane %v270_v11, %v269_v7  ;;  %v284_v16 = vrot.slane %v274_v12, %v269_v7 }
  0x75   : > { %v285_v17 = vmul.f32 %v280_v15, %v260_v9  ;;  %v286_v18 = vmul.f32 %v284_v16, %v261_v10  ;;  %v287_v19 = vmul.f32 %v280_v15, %v262_v13  ;;  %v288_v20 = vmul.f32 %v284_v16, %v263_v14 }
  0x77   : > { %v291_v21 = vadd.f32 %v286_v18, %v285_v17  ;;  %v294_v22 = vadd.f32 %v288_v20, %v287_v19 }
  0x79   : > { %292 = vadd.xlane.f32.xlu0 %v291_v21 }
  0x7d   : > { %295 = vadd.xlane.f32.xlu0 %v294_v22 }
 0x106   : > { %v293_v24 = vpop.xlane.xlu0 %292 }
 0x107   : > { %v297_v25 = vadd.f32 %v293_v24, %v289_v23  ;;  %305 = sbr.rel (%p449_p7) target bundleno = 306 (0x132), region = 48 }
 0x109   : > { %300 = vst.msk [vmem:[#allocation2] sm:$0xff] %vm299_vm1, %v297_v25 }
 0x10a   : > { %v296_v27 = vpop.xlane.xlu0 %295 }
 0x10b   : > { %v298_v28 = vadd.f32 %v296_v27, %v290_v26 }
 0x10d   : > { %301 = vst.msk [vmem:[#allocation2 + $0x8] sm:$0xff] %vm299_vm1, %v298_v28 }
 0x110   : > { %v306_v29 = vld [vmem:[#allocation2] sm:$0xff] }
 0x111   : > { %v310_v32 = vadd.f32 %v309_v31, %v306_v29 }
 0x113   : > { %v450_v34 = vmul.f32 -1.442695, %v310_v32 }
 0x114   : > { %v307_v30 = vld [vmem:[#allocation2 + $0x8] sm:$0xff] }
 0x115   : > { %v311_v33 = vadd.f32 %v309_v31, %v307_v30  ;;  %560 = vpow2.f32 %v450_v34 }
 0x117   : > { %v451_v35 = vmul.f32 -1.442695, %v311_v33 }
 0x119   : > { %562 = vpow2.f32 %v451_v35 }
 0x11f   : > { %v561_v36 = vpop.eup %560 }
 0x120   : > { %v318_v38 = vadd.f32 1.0, %v561_v36 }
 0x122   : > { %564 = vrcp.f32 %v318_v38 }
 0x123   : > { %v563_v37 = vpop.eup %562 }
 0x124   : > { %v319_v39 = vadd.f32 1.0, %v563_v37 }
 0x126   : > { %566 = vrcp.f32 %v319_v39 }
 0x12c   : > { %v565_v40 = vpop.eup %564 }
 0x12d   : > { %324 = vst.msk [vmem:[%s970_s17] sm:$0xff] %vm299_vm1, %v565_v40 }
 0x130   : > { %v567_v41 = vpop.eup %566 }
 0x131   : > { %325 = vst.msk [vmem:[%s970_s17 + $0x8] sm:$0xff] %vm299_vm1, %v567_v41 }
 0x132 PF: > { %s20_s23 = sadd.s32 1, %s722_s23   ;;  %s1031_s20 = smov %s913_s14 }
 0x133   : > { %p17_p0 = scmp.ge.s32.totalorder %s20_s23, 10   ;;  %s1032_s14 = smov %s686_s15 }
 0x134   : > { %s1033_s15 = smov %s690_s16  ;;  %s1034_s16 = smov %s897_s11 }
 0x135   : > { %s1035_s17 = smov %s698_s18  ;;  %s1036_s18 = smov %s702_s19 }
 0x136   : > { %s1037_s19 = smov %s1031_s20  ;;  %s1038_s20 = smov %s714_s2 }
 0x137   : > { %s1039_s21 = smov %s718_s22  ;;  %s1040_s2 = smov %s1043_s29 }
 0x138   : > { %s1041_s22 = smov %s1047_s24  ;;  %19 = sbr.rel (!%p17_p0) target bundleno = 11 (0xb), region = 93 }
 0x13f   :  { %348 = vsyncpa [#allocation5], 1 }
 0x140   :  { %350 = vsyncpa [#allocation5 + $0x1], 1 }
 0x141   :  { %351 = vsyncpa [#allocation7], 1 }
 0x142   :  { %353 = vsyncpa [#allocation7 + $0x1], 1 }

</bundles_post_ra>
